<compile_context>
chip_gen: v6e
topology: v6e:2x2x1
jax: 0.10.0
libtpu: 0.0.40
codegen_flags: <defaults>
</compile_context>

<pallas_src>
import functools

import jax
import jax.numpy as jnp
from jax import lax
from jax.experimental import pallas as pl
from jax.experimental.pallas import tpu as pltpu

LANE = 128  # TPU vreg lane width


def _mlp_kernel(x_ref, w1_ref, w2_ref, b_ref, o_ref, *, hidden_pad, labels_pad,
                num_labels):
    # x:  (B, E)   f32     w1: (E, Hp)  f32
    # w2: (Hp, Lp) f32     b:  (2, P)   f32 (row 0 = b1, row 1 = b2, zero-padded)
    # o:  (B, num_labels)  f32
    x = x_ref[...]
    # f32 matmuls at HIGHEST precision: latency-bound kernel, extra MXU passes
    # are invisible and logits keep full f32 accuracy.
    h = jnp.dot(x, w1_ref[...], preferred_element_type=jnp.float32,
                precision=lax.Precision.HIGHEST)
    h = jnp.tanh(h + b_ref[0:1, :hidden_pad])          # EUP tanh in f32
    out = jnp.dot(h, w2_ref[...], preferred_element_type=jnp.float32,
                  precision=lax.Precision.HIGHEST)
    out = out + b_ref[1:2, :labels_pad]
    # Store the unpadded logits directly; a masked vst on an 8x4 tile costs a
    # handful of cycles and removes the separate post-kernel slice dispatch.
    o_ref[...] = out[:, :num_labels].astype(o_ref.dtype)


def prepare_params(w1, b1, w2, b2):
    """One-time (init-time) parameter prep.

    PyTorch nn.Linear layout: w1 (H, E), b1 (H,), w2 (L, H), b2 (L,).
    Returns (w1p, w2p, bias) with weights transposed to (in, out), the hidden /
    label lane dims zero-padded to 128, and both biases packed into one (2, P)
    array (row 0 = b1, row 1 = b2).
    """
    H, E = w1.shape
    L, _ = w2.shape
    Hp = pl.cdiv(H, LANE) * LANE
    Lp = pl.cdiv(L, LANE) * LANE
    P = max(Hp, Lp)

    w1p = jnp.zeros((E, Hp), jnp.float32).at[:, :H].set(w1.T.astype(jnp.float32))
    w2p = jnp.zeros((Hp, Lp), jnp.float32).at[:H, :L].set(w2.T.astype(jnp.float32))
    bias = jnp.zeros((2, P), jnp.float32)
    bias = bias.at[0, :H].set(b1.astype(jnp.float32))
    bias = bias.at[1, :L].set(b2.astype(jnp.float32))
    return (w1p, w2p, bias), L


@functools.partial(jax.jit, static_argnames=("num_labels",))
def sentence_classifier_forward(x, params, num_labels):
    """x: (B, E) float32.  params: output of prepare_params (constants)."""
    w1p, w2p, bias = params
    B, E = x.shape
    Hp = w1p.shape[1]
    Lp = w2p.shape[1]

    kernel = functools.partial(_mlp_kernel, hidden_pad=Hp, labels_pad=Lp,
                               num_labels=num_labels)

    # Advisory cost hint so XLA can schedule/overlap this tiny custom call.
    flops = 2 * B * (E * Hp + Hp * Lp)
    transcendentals = B * Hp
    bytes_accessed = 4 * (x.size + w1p.size + w2p.size + bias.size
                          + B * num_labels)

    vmem = pl.BlockSpec(memory_space=pltpu.MemorySpace.VMEM)
    return pl.pallas_call(
        kernel,
        out_shape=jax.ShapeDtypeStruct((B, num_labels), jnp.float32),
        in_specs=[vmem, vmem, vmem, vmem],
        out_specs=vmem,
        cost_estimate=pl.CostEstimate(flops=flops,
                                      transcendentals=transcendentals,
                                      bytes_accessed=bytes_accessed),
    )(x, w1p, w2p, bias)


def reference_forward(x, w1, b1, w2, b2):
    # dropout(p=0.1) in eval mode == identity
    h = jnp.tanh(x @ w1.T + b1)
    return h @ w2.T + b2


if __name__ == "__main__":
    # Shapes consistent with the module:
    #   sentence_embedding_length = 32 -> hidden = 16, num_labels = 4, batch = 8
    B, E, L = 8, 32, 4
    H = E // 2

    key = jax.random.PRNGKey(0)
    kx, kw1, kb1, kw2, kb2 = jax.random.split(key, 5)

    x = jax.random.normal(kx, (B, E), dtype=jnp.float32)
    # Deterministic synthetic parameters (not a checkpoint load).
    w1 = jax.random.normal(kw1, (H, E), dtype=jnp.float32) * 0.1
    b1 = jax.random.normal(kb1, (H,), dtype=jnp.float32) * 0.1
    w2 = jax.random.normal(kw2, (L, H), dtype=jnp.float32) * 0.1
    b2 = jax.random.normal(kb2, (L,), dtype=jnp.float32) * 0.1

    params, num_labels = prepare_params(w1, b1, w2, b2)

    out = sentence_classifier_forward(x, params, num_labels)
    out = jax.block_until_ready(out)

    ref = reference_forward(x, w1, b1, w2, b2)
    assert out.shape == (B, L)
    # f32 MXU matmuls at HIGHEST precision -> tight tolerance.
    assert jnp.allclose(out, ref, atol=1e-4, rtol=1e-4), "mismatch vs reference"

    # TODO(synk): dropout (p=0.1) is treated as identity (eval-mode semantics);
    # training-mode stochastic dropout would use pltpu.prng_seed/prng_random_bits.
    print("KERNEL_OK")
</pallas_src>

<mosaic_0001>
module attributes {stable_mosaic.version = 11 : i64} {
  func.func @_mlp_kernel(%arg0: memref<8x32xf32, #tpu.memory_space<vmem>>, %arg1: memref<32x128xf32, #tpu.memory_space<vmem>>, %arg2: memref<128x128xf32, #tpu.memory_space<vmem>>, %arg3: memref<2x128xf32, #tpu.memory_space<vmem>>, %arg4: memref<8x4xf32, #tpu.memory_space<vmem>>) attributes {dimension_semantics = [], scalar_prefetch = 0 : i64, scratch_operands = 0 : i64, tpu.core_type = #tpu.core_type<tc>} {
    %c0 = arith.constant 0 : index
    %c0_0 = arith.constant 0 : index
    %0 = vector.load %arg0[%c0, %c0_0] : memref<8x32xf32, #tpu.memory_space<vmem>>, vector<8x32xf32>
    %c0_1 = arith.constant 0 : index
    %c0_2 = arith.constant 0 : index
    %1 = vector.load %arg1[%c0_1, %c0_2] : memref<32x128xf32, #tpu.memory_space<vmem>>, vector<32x128xf32>
    %cst = arith.constant dense<0.000000e+00> : vector<8x128xf32>
    %2 = tpu.matmul %0, %1, %cst {dimension_numbers = #tpu.dot_dimension_numbers<[1], [0], [0], [1], [0, 0, 1, 1], [], []>, precision = #tpu.contract_precision<fp32>} : vector<8x32xf32>, vector<32x128xf32>, vector<8x128xf32> -> vector<8x128xf32>
    %c0_3 = arith.constant 0 : index
    %c0_4 = arith.constant 0 : index
    %3 = vector.load %arg3[%c0_3, %c0_4] : memref<2x128xf32, #tpu.memory_space<vmem>>, vector<1x128xf32>
    %4 = vector.broadcast %3 : vector<1x128xf32> to vector<8x128xf32>
    %5 = arith.addf %2, %4 : vector<8x128xf32>
    %6 = math.tanh %5 : vector<8x128xf32>
    %c0_5 = arith.constant 0 : index
    %c0_6 = arith.constant 0 : index
    %7 = vector.load %arg2[%c0_5, %c0_6] : memref<128x128xf32, #tpu.memory_space<vmem>>, vector<128x128xf32>
    %cst_7 = arith.constant dense<0.000000e+00> : vector<8x128xf32>
    %8 = tpu.matmul %6, %7, %cst_7 {dimension_numbers = #tpu.dot_dimension_numbers<[1], [0], [0], [1], [0, 0, 1, 1], [], []>, precision = #tpu.contract_precision<fp32>} : vector<8x128xf32>, vector<128x128xf32>, vector<8x128xf32> -> vector<8x128xf32>
    %c1 = arith.constant 1 : index
    %c0_8 = arith.constant 0 : index
    %9 = vector.load %arg3[%c1, %c0_8] : memref<2x128xf32, #tpu.memory_space<vmem>>, vector<1x128xf32>
    %10 = vector.broadcast %9 : vector<1x128xf32> to vector<8x128xf32>
    %11 = arith.addf %8, %10 : vector<8x128xf32>
    %12 = vector.extract_strided_slice %11 {offsets = [0, 0], sizes = [8, 4], strides = [1, 1]} : vector<8x128xf32> to vector<8x4xf32>
    %c0_9 = arith.constant 0 : index
    %c0_10 = arith.constant 0 : index
    %13 = vector.load %arg4[%c0_9, %c0_10] : memref<8x4xf32, #tpu.memory_space<vmem>>, vector<8x4xf32>
    tpu.vector_store %arg4[%c0_9, %c0_10], %12 {strides = array<i32>} : memref<8x4xf32, #tpu.memory_space<vmem>>, vector<8x4xf32>,
    return
  }
}

</mosaic_0001>

<bundles_post_ra>
// kernel: sentence_classifier_forward.1
= control target key start
LH: loop header
LB: loop body
LE: loop exit
PB: predicated region body
PF: predicated region fallthrough
CT: control target
= control target key end

     0   :  { %9 = vsyncpa [#allocation3], 0  ;;  %s2184_s0 = inlined_call_operand.hbm [shape: f32[8,32], index: 0, kind: input, shape index: {}]   ;;  %s2185_s1 = inlined_call_operand.hbm [shape: f32[32,128], index: 1, kind: input, shape index: {}]   ;;  %s2186_s2 = inlined_call_operand.hbm [shape: f32[128,128], index: 2, kind: input, shape index: {}]   ;;  %s2187_s3 = inlined_call_operand.vmem [shape: f32[2,128], index: 3, kind: input, shape index: {}]   ;;  %s2188_s4 = inlined_call_operand.vmem [shape: f32[8,4], index: 4, kind: output, shape index: {}]  }
   0x1   :  { %10 = vsyncpa [#allocation5], 0  ;;  %s1709_s15 = smov [#allocation4]  }
   0x2   :  { %s26_s16 = sshll.u32 %s1709_s15, 4  ;;  %s27_s16 = int_to_ptr.vmem [resolvable:$true] %s26_s16 }
   0x3   :  { %s1653_s17 = scalar_lea.vmem %s27_s16, 512  ;;  %p1658_p1 = scmp.lt.s32.totalorder %s27_s16, %s27_s16 }
   0x4   :  { %p1654_p0 = scmp.ne.s32.totalorder %s27_s16, %s1653_s17  ;;  %p1659_p2 = scmp.lt.s32.totalorder %s1653_s17, %s1653_s17 }
   0x6   :  { %p1660_p3 = por %p1659_p2, %p1658_p1 }
   0x8   :  { %p1661_p4 = pnand %p1660_p3, %p1654_p0 }
   0xa   :  { %1664 = shalt.err (!%p1661_p4)
}
   0xb   :  { %s1710_s18 = smov 128   ;;  %s1711_s19 = smov 8  }
   0xc   :  { %32 = dma.hbm_to_vmem [thread:$0]  %s2185_s1, 512, %s27_s16, [#allocation5], %s1710_s18, %s1710_s18, %s1711_s19  }
   0xd   :  { %s1712_s22 = smov [#allocation2]   ;;  %s1713_s24 = smov [#allocation6]  }
   0xe   :  { %s17_s23 = sshll.u32 %s1712_s22, 4  ;;  %s38_s25 = sshll.u32 %s1713_s24, 4  ;;  %s18_s23 = int_to_ptr.vmem [resolvable:$true] %s17_s23  ;;  %s39_s25 = int_to_ptr.vmem [resolvable:$true] %s38_s25 }
   0xf   :  { %s1673_s26 = scalar_lea.vmem %s18_s23, 128  ;;  %p1678_p6 = scmp.lt.s32.totalorder %s18_s23, %s18_s23 }
  0x10   :  { %p1674_p5 = scmp.ne.s32.totalorder %s18_s23, %s1673_s26  ;;  %p1679_p7 = scmp.lt.s32.totalorder %s1673_s26, %s1673_s26 }
  0x12   :  { %p1680_p8 = por %p1679_p7, %p1678_p6 }
  0x14   :  { %p1681_p9 = pnand %p1680_p8, %p1674_p5 }
  0x16   :  { %1684 = shalt.err (!%p1681_p9)
}
  0x17   :  { %20 = dma.hbm_to_vmem [thread:$0]  %s2184_s0, 128, %s18_s23, [#allocation3]  }
  0x18   :  { %s1693_s29 = scalar_lea.vmem %s39_s25, 2048  ;;  %p1698_p11 = scmp.lt.s32.totalorder %s39_s25, %s39_s25 }
  0x19   :  { %p1694_p10 = scmp.ne.s32.totalorder %s39_s25, %s1693_s29  ;;  %p1699_p12 = scmp.lt.s32.totalorder %s1693_s29, %s1693_s29 }
  0x1b   :  { %p1700_p13 = por %p1699_p12, %p1698_p11 }
  0x1d   :  { %p1701_p0 = pnand %p1700_p13, %p1694_p10 }
  0x1f   :  { %1704 = shalt.err (!%p1701_p0)
}
  0x20   :  { %44 = dma.hbm_to_vmem [thread:$0]  %s2186_s2, 2048, %s39_s25, [#allocation5], %s1710_s18, %s1710_s18, %s1711_s19  }
  0x21   :  { %1705 = dma.done.wait [#allocation3], 128  }
  0x22   :  { %1706 = vsyncadd [#allocation3], 4294967168 }
  0x23   :  { %1707 = dma.done.wait [#allocation5], 2560  }
  0x24   :  { %1708 = vsyncadd [#allocation5], 4294964736  ;;  %v1714_v0 = vmov 0.0   ;;  %vm1715_vm0 = vmmov 0   ;;  %vm66_vm1 = vcmask 261120   ;;  %v60_v1 = vld [vmem:[#allocation4 + $0x18] sm:$0xff] }
  0x25   :  { %1360 = vmatprep.subr.mxu0 %v1714_v0  ;;  %1371 = vmatprep.subr.mxu1 %v1714_v0  ;;  %v59_v2 = vld [vmem:[#allocation4 + $0x10] sm:$0xff]  ;;  %v58_v3 = vld [vmem:[#allocation4 + $0x8] sm:$0xff]  ;;  %v1756_v4 = vand.u32 4294901760, %v60_v1  ;;  %v57_v7 = vld [vmem:[#allocation4] sm:$0xff]  ;;  %vm1218_vm2 = vcmask 31744  }
  0x26   :  { %1368 = vmatprep.mubr.msk.f32.mxu0 %vm1715_vm0, %v1714_v0  ;;  %1379 = vmatprep.mubr.msk.f32.mxu1 %vm1715_vm0, %v1714_v0  ;;  %v1758_v5 = vand.u32 4294901760, %v59_v2  ;;  %v1760_v6 = vand.u32 4294901760, %v58_v3  ;;  %v56_v8 = vld [vmem:[#allocation2] sm:$0xff]  ;;  %v1762_v9 = vand.u32 4294901760, %v57_v7  ;;  %v570_v34 = vld [vmem:[#allocation6 + $0x70] sm:$0xff]  ;;  %v569_v37 = vld [vmem:[#allocation6 + $0x68] sm:$0xff] }
  0x27   :  { %v68_v10 = vsel %vm66_vm1, %v56_v8, 0  ;;  %1361 = vmatpush3.msra.mxu0 %v1756_v4  ;;  %v175_v11 = vsub.f32 %v60_v1, %v1756_v4  ;;  %v571_v32 = vld [vmem:[#allocation6 + $0x78] sm:$0xff]  ;;  %v1827_v36 = vand.u32 4294901760, %v570_v34  ;;  %v1835_v40 = vand.u32 4294901760, %v569_v37  ;;  %v568_v41 = vld [vmem:[#allocation6 + $0x60] sm:$0xff]  ;;  %v566_v52 = vld [vmem:[#allocation6 + $0x50] sm:$0xff] }
  0x28   :  { %v1766_v12 = vand.u32 4294901760, %v68_v10  ;;  %v182_v13 = vsub.f32 %v59_v2, %v1758_v5  ;;  %v189_v14 = vsub.f32 %v58_v3, %v1760_v6  ;;  %1362 = vmatprep.subr.mxu0 %v1714_v0  ;;  %v196_v15 = vsub.f32 %v57_v7, %v1762_v9  ;;  %v567_v46 = vld [vmem:[#allocation6 + $0x58] sm:$0xff]  ;;  %v565_v58 = vld [vmem:[#allocation6 + $0x48] sm:$0xff]  ;;  %v564_v1 = vld [vmem:[#allocation6 + $0x40] sm:$0xff] }
  0x29   :  { %1363 = vmatpush3.msra.mxu0 %v1758_v5  ;;  %v176_v16 = vand.u32 4294901760, %v175_v11  ;;  %v1822_v33 = vand.u32 4294901760, %v571_v32  ;;  %v1833_v39 = vsub.f32 %v570_v34, %v1827_v36  ;;  %v1844_v44 = vsub.f32 %v569_v37, %v1835_v40  ;;  %v563_v7 = vld [vmem:[#allocation6 + $0x38] sm:$0xff] }
  0x2a   :  { %v140_v17 = vsub.f32 %v68_v10, %v1766_v12  ;;  %v183_v18 = vand.u32 4294901760, %v182_v13  ;;  %v190_v19 = vand.u32 4294901760, %v189_v14  ;;  %1364 = vmatprep.subr.mxu0 %v1714_v0  ;;  %v197_v20 = vand.u32 4294901760, %v196_v15 }
  0x2b   :  { %1365 = vmatpush3.msra.mxu0 %v1760_v6  ;;  %v177_v21 = vsub.f32 %v175_v11, %v176_v16  ;;  %v1825_v35 = vsub.f32 %v571_v32, %v1822_v33  ;;  %v678_v43 = vand.u32 4294901760, %v1833_v39  ;;  %v1846_v45 = vand.u32 4294901760, %v568_v41 }
  0x2c   :  { %v141_v22 = vand.u32 4294901760, %v140_v17  ;;  %v184_v23 = vsub.f32 %v182_v13, %v183_v18  ;;  %v191_v24 = vsub.f32 %v189_v14, %v190_v19  ;;  %1366 = vmatprep.subr.mxu0 %v1714_v0  ;;  %v198_v28 = vsub.f32 %v196_v15, %v197_v20 }
  0x2d   :  { %1367 = vmatpush3.msra.mxu0 %v1762_v9  ;;  %v178_v25 = vand.u32 4294901760, %v177_v21  ;;  %v671_v38 = vand.u32 4294901760, %v1825_v35  ;;  %v679_v48 = vsub.f32 %v1833_v39, %v678_v43  ;;  %v685_v49 = vand.u32 4294901760, %v1844_v44 }
  0x2e   :  { %v142_v26 = vsub.f32 %v140_v17, %v141_v22  ;;  %v185_v27 = vand.u32 4294901760, %v184_v23  ;;  %1382 = vmatprep.subr.mxu0 %v1714_v0  ;;  %v192_v30 = vand.u32 4294901760, %v191_v24  ;;  %v199_v31 = vand.u32 4294901760, %v198_v28 }
  0x2f   :  { %1372 = vmatpush3.msra.mxu1 %v178_v25  ;;  %v672_v42 = vsub.f32 %v1825_v35, %v671_v38  ;;  %v1855_v50 = vsub.f32 %v568_v41, %v1846_v45  ;;  %v1858_v51 = vand.u32 4294901760, %v567_v46  ;;  %v680_v53 = vand.u32 4294901760, %v679_v48  ;;  %v560_v25 = vld [vmem:[#allocation6 + $0x20] sm:$0xff] }
  0x30   :  { %v143_v29 = vand.u32 4294901760, %v142_v26  ;;  %1373 = vmatprep.subr.mxu1 %v1714_v0  ;;  %v686_v54 = vsub.f32 %v1844_v44, %v685_v49  ;;  %v1865_v56 = vand.u32 4294901760, %v566_v52  ;;  %v1878_v62 = vand.u32 4294901760, %v565_v58 }
  0x31   :  { %1374 = vmatpush3.msra.mxu1 %v185_v27  ;;  %v673_v47 = vand.u32 4294901760, %v672_v42  ;;  %v692_v55 = vand.u32 4294901760, %v1855_v50  ;;  %v1869_v57 = vsub.f32 %v567_v46, %v1858_v51  ;;  %v558_v46 = vld [vmem:[#allocation6 + $0x10] sm:$0xff] }
  0x32   :  { %1369 = vmatmul.mubr.f32.vlgmr.msra.gmra.mxu0 %v143_v29  ;;  %1375 = vmatprep.subr.mxu1 %v1714_v0  ;;  %v687_v59 = vand.u32 4294901760, %v686_v54  ;;  %v1876_v61 = vsub.f32 %v566_v52, %v1865_v56  ;;  %v1938_v29 = vand.u32 4294901760, %v560_v25  ;;  %v557_v54 = vld [vmem:[#allocation6 + $0x8] sm:$0xff] }
  0x33   :  { %1383 = vmatpush3.msra.mxu0 %v175_v11  ;;  %1376 = vmatpush3.msra.mxu1 %v192_v30  ;;  %v693_v60 = vsub.f32 %v1855_v50, %v692_v55  ;;  %v699_v63 = vand.u32 4294901760, %v1869_v57  ;;  %v1903_v11 = vand.u32 4294901760, %v563_v7 }
  0x34   :  { %1384 = vmatprep.subr.mxu0 %v1714_v0  ;;  %1377 = vmatprep.subr.mxu1 %v1714_v0  ;;  %v706_v3 = vand.u32 4294901760, %v1876_v61  ;;  %v1946_v37 = vsub.f32 %v560_v25, %v1938_v29 }
  0x35   :  { %1385 = vmatpush3.msra.mxu0 %v182_v13  ;;  %1378 = vmatpush3.msra.mxu1 %v199_v31  ;;  %v694_v2 = vand.u32 4294901760, %v693_v60  ;;  %v562_v13 = vld [vmem:[#allocation6 + $0x30] sm:$0xff]  ;;  %v559_v31 = vld [vmem:[#allocation6 + $0x18] sm:$0xff]  ;;  %v1966_v60 = vand.u32 4294901760, %v557_v54 }
  0x36   :  { %1386 = vmatprep.subr.mxu0 %v1714_v0  ;;  %1380 = vmatmul.mubr.f32.vlgmr.msra.gmra.mxu1 %v1766_v12  ;;  %v707_v8 = vsub.f32 %v1876_v61, %v706_v3  ;;  %v1948_v41 = vand.u32 4294901760, %v559_v31  ;;  %v2193_v48 = vand.u32 4294901760, %v1946_v37 }
  0x37   :  { %1387 = vmatpush3.msra.mxu0 %v189_v14  ;;  %1393 = vmatprep.subr.mxu1 %v1714_v0 }
  0x38   :  { %1388 = vmatprep.subr.mxu0 %v1714_v0  ;;  %1394 = vmatpush3.msra.mxu1 %v1756_v4  ;;  %v708_v14 = vand.u32 4294901760, %v707_v8  ;;  %v1961_v52 = vsub.f32 %v559_v31, %v1948_v41 }
  0x39   :  { %1389 = vmatpush3.msra.mxu0 %v196_v15  ;;  %1390 = vmatprep.mubr.msk.f32.mxu0 %vm1715_vm0, %v1714_v0 }
  0x3a   :  { %1395 = vmatprep.subr.mxu1 %v1714_v0  ;;  %1404 = vmatprep.subr.mxu0 %v1714_v0 }
  0x3b   :  { %1391 = vmatmul.mubr.f32.vlgmr.msra.gmra.mxu0 %v140_v17  ;;  %1396 = vmatpush3.msra.mxu1 %v1758_v5  ;;  %v1913_v17 = vsub.f32 %v563_v7, %v1903_v11  ;;  %v2192_v7 = vand.u32 4294901760, %v1961_v52 }
  0x3c   :  { %1405 = vmatpush3.msra.mxu0 %v176_v16  ;;  %1397 = vmatprep.subr.mxu1 %v1714_v0 }
  0x3d   :  { %1406 = vmatprep.subr.mxu0 %v1714_v0  ;;  %1398 = vmatpush3.msra.mxu1 %v1760_v6 }
  0x3e   :  { %1407 = vmatpush3.msra.mxu0 %v183_v18  ;;  %1399 = vmatprep.subr.mxu1 %v1714_v0  ;;  %v1916_v18 = vand.u32 4294901760, %v562_v13 }
  0x3f   :  { %1408 = vmatprep.subr.mxu0 %v1714_v0  ;;  %1400 = vmatpush3.msra.mxu1 %v1762_v9 }
  0x40   :  { %1401 = vmatprep.mubr.msk.f32.mxu1 %vm1715_vm0, %v1714_v0  ;;  %1409 = vmatpush3.msra.mxu0 %v190_v19  ;;  %v561_v19 = vld [vmem:[#allocation6 + $0x28] sm:$0xff]  ;;  %v1928_v24 = vsub.f32 %v562_v13, %v1916_v18 }
  0x41   :  { %1402 = vmatmul.mubr.f32.vlgmr.msra.gmra.mxu1 %v141_v22  ;;  %1410 = vmatprep.subr.mxu0 %v1714_v0  ;;  %v727_v22 = vand.u32 4294901760, %v1913_v17  ;;  %v1924_v23 = vand.u32 4294901760, %v561_v19 }
  0x42   :  { %1415 = vmatprep.subr.mxu1 %v1714_v0  ;;  %1411 = vmatpush3.msra.mxu0 %v197_v20  ;;  %v734_v30 = vand.u32 4294901760, %v1928_v24 }
  0x43   :  { %1412 = vmatprep.mubr.msk.f32.mxu0 %vm1715_vm0, %v1714_v0  ;;  %1416 = vmatpush3.msra.mxu1 %v1756_v4  ;;  %v1886_v4 = vsub.f32 %v565_v58, %v1878_v62  ;;  %v728_v27 = vsub.f32 %v1913_v17, %v727_v22  ;;  %v1936_v28 = vsub.f32 %v561_v19, %v1924_v23  ;;  %v556_v58 = vld [vmem:[#allocation6] sm:$0xff] }
  0x44   :  { %1413 = vmatmul.mubr.f32.vlgmr.msra.gmra.mxu0 %v1766_v12  ;;  %1417 = vmatprep.subr.mxu1 %v1714_v0  ;;  %v735_v42 = vsub.f32 %v1928_v24, %v734_v30 }
  0x45   :  { %1423 = vmatprep.mubr.msk.f32.mxu1 %vm1715_vm0, %v1714_v0  ;;  %1418 = vmatpush3.msra.mxu1 %v1758_v5  ;;  %v1888_v5 = vand.u32 4294901760, %v564_v1  ;;  %v729_v32 = vand.u32 4294901760, %v728_v27  ;;  %v741_v34 = vand.u32 4294901760, %v1936_v28 }
  0x46   :  { %1426 = vmatprep.subr.mxu0 %v1714_v0  ;;  %1419 = vmatprep.subr.mxu1 %v1714_v0 }
  0x47   :  { %1458 = vmatprep.mubr.msk.f32.mxu0 %vm1715_vm0, %v1714_v0  ;;  %1420 = vmatpush3.msra.mxu1 %v1760_v6  ;;  %v700_v6 = vsub.f32 %v1869_v57, %v699_v63  ;;  %v1901_v10 = vsub.f32 %v564_v1, %v1888_v5  ;;  %v1968_v1 = vand.u32 4294901760, %v556_v58 }
  0x48   :  { %1421 = vmatprep.subr.mxu1 %v1714_v0  ;;  %1427 = vmatpush3.msra.mxu0 %v1822_v33 }
  0x49   :  { %1422 = vmatpush3.msra.mxu1 %v1762_v9  ;;  %1428 = vmatprep.subr.mxu0 %v1714_v0  ;;  %v713_v9 = vand.u32 4294901760, %v1886_v4  ;;  %v720_v16 = vand.u32 4294901760, %v1901_v10  ;;  %v1984_v13 = vsub.f32 %v556_v58, %v1968_v1 }
  0x4a   :  { %1424 = vmatmul.mubr.f32.vlgmr.msra.gmra.mxu1 %v1766_v12  ;;  %1461 = vmatprep.subr.mxu1 %v1714_v0  ;;  %v701_v12 = vand.u32 4294901760, %v700_v6  ;;  %v749_v6 = vsub.f32 %v1946_v37, %v2193_v48 }
  0x4b   :  { %1493 = vmatprep.mubr.msk.f32.mxu1 %vm1715_vm0, %v1714_v0  ;;  %1429 = vmatpush3.msra.mxu0 %v1827_v36  ;;  %v714_v15 = vsub.f32 %v1886_v4, %v713_v9  ;;  %v721_v21 = vsub.f32 %v1901_v10, %v720_v16 }
  0x4c   :  { %1430 = vmatprep.subr.mxu0 %v1714_v0  ;;  %1462 = vmatpush3.msra.mxu1 %v673_v47  ;;  %v742_v47 = vsub.f32 %v1936_v28, %v741_v34 }
  0x4d   :  { %1431 = vmatpush3.msra.mxu0 %v1835_v40  ;;  %1463 = vmatprep.subr.mxu1 %v1714_v0  ;;  %v715_v20 = vand.u32 4294901760, %v714_v15  ;;  %v722_v26 = vand.u32 4294901760, %v721_v21  ;;  %v756_v15 = vsub.f32 %v1961_v52, %v2192_v7  ;;  %v2189_v21 = vand.u32 4294901760, %v1984_v13 }
  0x4e   :  { %1432 = vmatprep.subr.mxu0 %v1714_v0  ;;  %1464 = vmatpush3.msra.mxu1 %v680_v53  ;;  %v1963_v53 = vand.u32 4294901760, %v558_v46 }
  0x4f   :  { %1433 = vmatpush3.msra.mxu0 %v1846_v45  ;;  %1465 = vmatprep.subr.mxu1 %v1714_v0  ;;  %v757_v25 = vand.u32 4294901760, %v756_v15  ;;  %v777_v31 = vsub.f32 %v1984_v13, %v2189_v21 }
  0x50   :  { %1434 = vmatprep.subr.mxu0 %v1714_v0  ;;  %1466 = vmatpush3.msra.mxu1 %v687_v59  ;;  %v736_v59 = vand.u32 4294901760, %v735_v42  ;;  %v1977_v8 = vsub.f32 %v558_v46, %v1963_v53 }
  0x51   :  { %1435 = vmatpush3.msra.mxu0 %v1858_v51  ;;  %1467 = vmatprep.subr.mxu1 %v1714_v0  ;;  %v778_v46 = vand.u32 4294901760, %v777_v31 }
  0x52   :  { %1436 = vmatprep.subr.mxu0 %v1714_v0  ;;  %1468 = vmatpush3.msra.mxu1 %v694_v2  ;;  %v743_v2 = vand.u32 4294901760, %v742_v47  ;;  %v2191_v19 = vand.u32 4294901760, %v1977_v8 }
  0x53   :  { %1437 = vmatpush3.msra.mxu0 %v1865_v56  ;;  %1469 = vmatprep.subr.mxu1 %v1714_v0 }
  0x54   :  { %1438 = vmatprep.subr.mxu0 %v1714_v0  ;;  %1470 = vmatpush3.msra.mxu1 %v701_v12  ;;  %v1981_v12 = vsub.f32 %v557_v54, %v1966_v60 }
  0x55   :  { %1439 = vmatpush3.msra.mxu0 %v1878_v62  ;;  %1471 = vmatprep.subr.mxu1 %v1714_v0 }
  0x56   :  { %1440 = vmatprep.subr.mxu0 %v1714_v0  ;;  %1472 = vmatpush3.msra.mxu1 %v708_v14  ;;  %v750_v14 = vand.u32 4294901760, %v749_v6 }
  0x57   :  { %1441 = vmatpush3.msra.mxu0 %v1888_v5  ;;  %1473 = vmatprep.subr.mxu1 %v1714_v0 }
  0x58   :  { %1442 = vmatprep.subr.mxu0 %v1714_v0  ;;  %1474 = vmatpush3.msra.mxu1 %v715_v20  ;;  %v2190_v20 = vand.u32 4294901760, %v1981_v12 }
  0x59   :  { %1443 = vmatpush3.msra.mxu0 %v1903_v11  ;;  %1475 = vmatprep.subr.mxu1 %v1714_v0 }
  0x5a   :  { %1444 = vmatprep.subr.mxu0 %v1714_v0  ;;  %1476 = vmatpush3.msra.mxu1 %v722_v26  ;;  %v763_v26 = vsub.f32 %v1977_v8, %v2191_v19  ;;  %v770_v27 = vsub.f32 %v1981_v12, %v2190_v20 }
  0x5b   :  { %1445 = vmatpush3.msra.mxu0 %v1916_v18  ;;  %1477 = vmatprep.subr.mxu1 %v1714_v0 }
  0x5c   :  { %1446 = vmatprep.subr.mxu0 %v1714_v0  ;;  %1478 = vmatpush3.msra.mxu1 %v729_v32  ;;  %v764_v32 = vand.u32 4294901760, %v763_v26  ;;  %v771_v42 = vand.u32 4294901760, %v770_v27 }
  0x5d   :  { %1447 = vmatpush3.msra.mxu0 %v1924_v23  ;;  %1479 = vmatprep.subr.mxu1 %v1714_v0 }
  0x5e   :  { %1448 = vmatprep.subr.mxu0 %v1714_v0  ;;  %1480 = vmatpush3.msra.mxu1 %v736_v59  ;;  %v1226_v59 = vld [vmem:[%s2187_s3] ss:$0 sm:$0xff] }
  0x5f   :  { %1449 = vmatpush3.msra.mxu0 %v1938_v29  ;;  %1481 = vmatprep.subr.mxu1 %v1714_v0 }
  0x60   :  { %1450 = vmatprep.subr.mxu0 %v1714_v0  ;;  %1482 = vmatpush3.msra.mxu1 %v743_v2 }
  0x61   :  { %1451 = vmatpush3.msra.mxu0 %v1948_v41  ;;  %1483 = vmatprep.subr.mxu1 %v1714_v0 }
  0x62   :  { %1452 = vmatprep.subr.mxu0 %v1714_v0  ;;  %1484 = vmatpush3.msra.mxu1 %v750_v14 }
  0x63   :  { %1453 = vmatpush3.msra.mxu0 %v1963_v53  ;;  %1485 = vmatprep.subr.mxu1 %v1714_v0 }
  0x64   :  { %1454 = vmatprep.subr.mxu0 %v1714_v0  ;;  %1486 = vmatpush3.msra.mxu1 %v757_v25 }
  0x65   :  { %1455 = vmatpush3.msra.mxu0 %v1966_v60  ;;  %1487 = vmatprep.subr.mxu1 %v1714_v0 }
  0x66   :  { %1456 = vmatprep.subr.mxu0 %v1714_v0  ;;  %1488 = vmatpush3.msra.mxu1 %v764_v32 }
  0x67   :  { %1457 = vmatpush3.msra.mxu0 %v1968_v1  ;;  %1489 = vmatprep.subr.mxu1 %v1714_v0 }
  0x68   :  { %1496 = vmatprep.subr.mxu0 %v1714_v0  ;;  %1490 = vmatpush3.msra.mxu1 %v771_v42 }
  0x69   :  { %1491 = vmatprep.subr.mxu1 %v1714_v0 }
  0x6a   :  { %1492 = vmatpush3.msra.mxu1 %v778_v46 }
  0x6b   :  { %1531 = vmatprep.subr.mxu1 %v1714_v0 }
  0xf2   :  { %v145_v47 = vpop.f32.mrf.mxu0 }
  0xf3   :  { %v146_v14 = vadd.f32 %v1226_v59, %v145_v47 }
  0xf4   :  { %v1370_v54 = vpop.f32.mrf.mxu0 }
  0xf6   :  { %v236_v58 = vpop.f32.mrf.mxu1 }
  0xf7   :  { %v237_v25 = vadd.f32 %v236_v58, %v146_v14 }
  0xf8   :  { %v1381_v2 = vpop.f32.mrf.mxu1 }
  0xfb   :  { %v316_v6 = vpop.f32.mrf.mxu0 }
  0xfc   :  { %v317_v31 = vadd.f32 %v316_v6, %v237_v25 }
  0xfd   :  { %v1392_v15 = vpop.f32.mrf.mxu0 }
 0x101   :  { %v393_v26 = vpop.f32.mrf.mxu1 }
 0x102   :  { %v394_v42 = vadd.f32 %v393_v26, %v317_v31 }
 0x103   :  { %v1403_v27 = vpop.f32.mrf.mxu1 }
 0x104   :  { %v476_v32 = vpop.f32.mrf.mxu0 }
 0x105   :  { %v477_v21 = vadd.f32 %v476_v32, %v394_v42 }
 0x106   :  { %v1414_v46 = vpop.f32.mrf.mxu0 }
 0x10a   :  { %v551_v20 = vpop.f32.mrf.mxu1 }
 0x10b   :  { %v552_v19 = vadd.f32 %v551_v20, %v477_v21 }
 0x10c   :  { %v1425_v54 = vpop.f32.mrf.mxu1 }
 0x10d   :  { %1643 = vtanh.f32 %v552_v19 }
 0x11a   :  { %v1644_v7 = vpop.eup %1643 }
 0x11b   :  { %v2017_v48 = vand.u32 4294901760, %v1644_v7 }
 0x11d   :  { %1494 = vmatmul.mubr.f32.vlgmr.msra.gmra.mxu1 %v2017_v48  ;;  %v2021_v47 = vsub.f32 %v1644_v7, %v2017_v48 }
 0x11e   :  { %1532 = vmatpush3.msra.mxu1 %v1822_v33  ;;  %1563 = vmatprep.mubr.msk.f32.mxu1 %vm1715_vm0, %v1714_v0 }
 0x11f   :  { %1533 = vmatprep.subr.mxu1 %v1714_v0  ;;  %v660_v58 = vand.u32 4294901760, %v2021_v47 }
 0x120   :  { %1534 = vmatpush3.msra.mxu1 %v1827_v36 }
 0x121   :  { %1535 = vmatprep.subr.mxu1 %v1714_v0  ;;  %v661_v19 = vsub.f32 %v2021_v47, %v660_v58 }
 0x122   :  { %1536 = vmatpush3.msra.mxu1 %v1835_v40 }
 0x123   :  { %1537 = vmatprep.subr.mxu1 %v1714_v0  ;;  %v662_v7 = vand.u32 4294901760, %v661_v19 }
 0x124   :  { %1538 = vmatpush3.msra.mxu1 %v1846_v45 }
 0x125   :  { %1539 = vmatprep.subr.mxu1 %v1714_v0  ;;  %1459 = vmatmul.mubr.f32.vlgmr.msra.gmra.mxu0 %v662_v7 }
 0x126   :  { %1497 = vmatpush3.msra.mxu0 %v1825_v35  ;;  %1540 = vmatpush3.msra.mxu1 %v1858_v51  ;;  %v2195_v35 = vand.u32 4294901760, %v1961_v52 }
 0x127   :  { %1498 = vmatprep.subr.mxu0 %v1714_v0  ;;  %1541 = vmatprep.subr.mxu1 %v1714_v0 }
 0x128   :  { %1499 = vmatpush3.msra.mxu0 %v1833_v39  ;;  %1542 = vmatpush3.msra.mxu1 %v1865_v56  ;;  %v2198_v39 = vand.u32 4294901760, %v1984_v13 }
 0x129   :  { %1500 = vmatprep.subr.mxu0 %v1714_v0  ;;  %1543 = vmatprep.subr.mxu1 %v1714_v0 }
 0x12a   :  { %1501 = vmatpush3.msra.mxu0 %v1844_v44  ;;  %1544 = vmatpush3.msra.mxu1 %v1878_v62 }
 0x12b   :  { %1502 = vmatprep.subr.mxu0 %v1714_v0  ;;  %1545 = vmatprep.subr.mxu1 %v1714_v0 }
 0x12c   :  { %1503 = vmatpush3.msra.mxu0 %v1855_v50  ;;  %1546 = vmatpush3.msra.mxu1 %v1888_v5 }
 0x12d   :  { %1504 = vmatprep.subr.mxu0 %v1714_v0  ;;  %1547 = vmatprep.subr.mxu1 %v1714_v0 }
 0x12e   :  { %1505 = vmatpush3.msra.mxu0 %v1869_v57  ;;  %1548 = vmatpush3.msra.mxu1 %v1903_v11 }
 0x12f   :  { %1506 = vmatprep.subr.mxu0 %v1714_v0  ;;  %1549 = vmatprep.subr.mxu1 %v1714_v0 }
 0x130   :  { %1507 = vmatpush3.msra.mxu0 %v1876_v61  ;;  %1550 = vmatpush3.msra.mxu1 %v1916_v18 }
 0x131   :  { %1508 = vmatprep.subr.mxu0 %v1714_v0  ;;  %1551 = vmatprep.subr.mxu1 %v1714_v0 }
 0x132   :  { %1509 = vmatpush3.msra.mxu0 %v1886_v4  ;;  %1552 = vmatpush3.msra.mxu1 %v1924_v23 }
 0x133   :  { %1510 = vmatprep.subr.mxu0 %v1714_v0  ;;  %1553 = vmatprep.subr.mxu1 %v1714_v0 }
 0x134   :  { %1511 = vmatpush3.msra.mxu0 %v1901_v10  ;;  %1554 = vmatpush3.msra.mxu1 %v1938_v29 }
 0x135   :  { %1512 = vmatprep.subr.mxu0 %v1714_v0  ;;  %1555 = vmatprep.subr.mxu1 %v1714_v0 }
 0x136   :  { %1513 = vmatpush3.msra.mxu0 %v1913_v17  ;;  %1556 = vmatpush3.msra.mxu1 %v1948_v41 }
 0x137   :  { %1514 = vmatprep.subr.mxu0 %v1714_v0  ;;  %1557 = vmatprep.subr.mxu1 %v1714_v0 }
 0x138   :  { %1515 = vmatpush3.msra.mxu0 %v1928_v24  ;;  %1558 = vmatpush3.msra.mxu1 %v1963_v53 }
 0x139   :  { %1516 = vmatprep.subr.mxu0 %v1714_v0  ;;  %1559 = vmatprep.subr.mxu1 %v1714_v0 }
 0x13a   :  { %1517 = vmatpush3.msra.mxu0 %v1936_v28  ;;  %1560 = vmatpush3.msra.mxu1 %v1966_v60 }
 0x13b   :  { %1518 = vmatprep.subr.mxu0 %v1714_v0  ;;  %1561 = vmatprep.subr.mxu1 %v1714_v0 }
 0x13c   :  { %1519 = vmatpush3.msra.mxu0 %v1946_v37  ;;  %1562 = vmatpush3.msra.mxu1 %v1968_v1 }
 0x13d   :  { %1520 = vmatprep.subr.mxu0 %v1714_v0  ;;  %1564 = vmatmul.mubr.f32.vlgmr.msra.gmra.mxu1 %v660_v58 }
 0x13e   :  { %1601 = vmatprep.subr.mxu1 %v1714_v0  ;;  %1521 = vmatpush3.msra.mxu0 %v1961_v52 }
 0x13f   :  { %1602 = vmatpush3.msra.mxu1 %v1822_v33  ;;  %1522 = vmatprep.subr.mxu0 %v1714_v0  ;;  %v2194_v33 = vand.u32 4294901760, %v1946_v37 }
 0x140   :  { %1603 = vmatprep.subr.mxu1 %v1714_v0  ;;  %1523 = vmatpush3.msra.mxu0 %v1977_v8 }
 0x141   :  { %1604 = vmatpush3.msra.mxu1 %v1827_v36  ;;  %1524 = vmatprep.subr.mxu0 %v1714_v0  ;;  %v2196_v36 = vand.u32 4294901760, %v1977_v8 }
 0x142   :  { %1605 = vmatprep.subr.mxu1 %v1714_v0  ;;  %1525 = vmatpush3.msra.mxu0 %v1981_v12 }
 0x143   :  { %1606 = vmatpush3.msra.mxu1 %v1835_v40  ;;  %1526 = vmatprep.subr.mxu0 %v1714_v0 }
 0x144   :  { %1607 = vmatprep.subr.mxu1 %v1714_v0  ;;  %1527 = vmatpush3.msra.mxu0 %v1984_v13 }
 0x145   :  { %1528 = vmatprep.mubr.msk.f32.mxu0 %vm1715_vm0, %v1714_v0  ;;  %1608 = vmatpush3.msra.mxu1 %v1846_v45 }
 0x146   :  { %1529 = vmatmul.mubr.f32.vlgmr.msra.gmra.mxu0 %v2021_v47  ;;  %1566 = vmatprep.subr.mxu0 %v1714_v0 }
 0x147   :  { %1609 = vmatprep.subr.mxu1 %v1714_v0  ;;  %1567 = vmatpush3.msra.mxu0 %v671_v38  ;;  %v2197_v38 = vand.u32 4294901760, %v1981_v12 }
 0x148   :  { %1610 = vmatpush3.msra.mxu1 %v1858_v51  ;;  %1568 = vmatprep.subr.mxu0 %v1714_v0 }
 0x149   :  { %1611 = vmatprep.subr.mxu1 %v1714_v0  ;;  %1569 = vmatpush3.msra.mxu0 %v678_v43 }
 0x14a   :  { %1612 = vmatpush3.msra.mxu1 %v1865_v56  ;;  %1570 = vmatprep.subr.mxu0 %v1714_v0  ;;  %v1227_v56 = vld [vmem:[%s2187_s3 + $0x1] ss:$0 sm:$0xff] }
 0x14b   :  { %1613 = vmatprep.subr.mxu1 %v1714_v0  ;;  %1571 = vmatpush3.msra.mxu0 %v685_v49 }
 0x14c   :  { %1614 = vmatpush3.msra.mxu1 %v1878_v62  ;;  %1572 = vmatprep.subr.mxu0 %v1714_v0 }
 0x14d   :  { %1615 = vmatprep.subr.mxu1 %v1714_v0  ;;  %1573 = vmatpush3.msra.mxu0 %v692_v55 }
 0x14e   :  { %1616 = vmatpush3.msra.mxu1 %v1888_v5  ;;  %1574 = vmatprep.subr.mxu0 %v1714_v0 }
 0x14f   :  { %1617 = vmatprep.subr.mxu1 %v1714_v0  ;;  %1575 = vmatpush3.msra.mxu0 %v699_v63 }
 0x150   :  { %1618 = vmatpush3.msra.mxu1 %v1903_v11  ;;  %1576 = vmatprep.subr.mxu0 %v1714_v0 }
 0x151   :  { %1619 = vmatprep.subr.mxu1 %v1714_v0  ;;  %1577 = vmatpush3.msra.mxu0 %v706_v3 }
 0x152   :  { %1620 = vmatpush3.msra.mxu1 %v1916_v18  ;;  %1578 = vmatprep.subr.mxu0 %v1714_v0 }
 0x153   :  { %1621 = vmatprep.subr.mxu1 %v1714_v0  ;;  %1579 = vmatpush3.msra.mxu0 %v713_v9 }
 0x154   :  { %1622 = vmatpush3.msra.mxu1 %v1924_v23  ;;  %1580 = vmatprep.subr.mxu0 %v1714_v0 }
 0x155   :  { %1623 = vmatprep.subr.mxu1 %v1714_v0  ;;  %1581 = vmatpush3.msra.mxu0 %v720_v16 }
 0x156   :  { %1624 = vmatpush3.msra.mxu1 %v1938_v29  ;;  %1582 = vmatprep.subr.mxu0 %v1714_v0 }
 0x157   :  { %1625 = vmatprep.subr.mxu1 %v1714_v0  ;;  %1583 = vmatpush3.msra.mxu0 %v727_v22 }
 0x158   :  { %1626 = vmatpush3.msra.mxu1 %v1948_v41  ;;  %1584 = vmatprep.subr.mxu0 %v1714_v0 }
 0x159   :  { %1627 = vmatprep.subr.mxu1 %v1714_v0  ;;  %1585 = vmatpush3.msra.mxu0 %v734_v30 }
 0x15a   :  { %1628 = vmatpush3.msra.mxu1 %v1963_v53  ;;  %1586 = vmatprep.subr.mxu0 %v1714_v0 }
 0x15b   :  { %1629 = vmatprep.subr.mxu1 %v1714_v0  ;;  %1587 = vmatpush3.msra.mxu0 %v741_v34 }
 0x15c   :  { %1630 = vmatpush3.msra.mxu1 %v1966_v60  ;;  %1588 = vmatprep.subr.mxu0 %v1714_v0 }
 0x15d   :  { %1631 = vmatprep.subr.mxu1 %v1714_v0  ;;  %1589 = vmatpush3.msra.mxu0 %v2194_v33 }
 0x15e   :  { %1632 = vmatpush3.msra.mxu1 %v1968_v1  ;;  %1633 = vmatprep.mubr.msk.f32.mxu1 %vm1715_vm0, %v1714_v0 }
 0x15f   :  { %1590 = vmatprep.subr.mxu0 %v1714_v0  ;;  %1634 = vmatmul.mubr.f32.vlgmr.msra.gmra.mxu1 %v2017_v48 }
 0x160   :  { %1591 = vmatpush3.msra.mxu0 %v2195_v35  ;;  %1598 = vmatprep.mubr.msk.f32.mxu0 %vm1715_vm0, %v1714_v0 }
 0x161   :  { %1592 = vmatprep.subr.mxu0 %v1714_v0 }
 0x162   :  { %1593 = vmatpush3.msra.mxu0 %v2196_v36 }
 0x163   :  { %1594 = vmatprep.subr.mxu0 %v1714_v0 }
 0x164   :  { %1595 = vmatpush3.msra.mxu0 %v2197_v38 }
 0x165   :  { %1596 = vmatprep.subr.mxu0 %v1714_v0 }
 0x166   :  { %1597 = vmatpush3.msra.mxu0 %v2198_v39 }
 0x167   :  { %1599 = vmatmul.mubr.f32.vlgmr.msra.gmra.mxu0 %v2017_v48 }
 0x1dd   :  { %v815_v40 = vpop.f32.mrf.mxu1 }
 0x1df   :  { %v1495_v43 = vpop.f32.mrf.mxu1 }
 0x1e5   :  { %v664_v44 = vpop.f32.mrf.mxu0 }
 0x1e6   :  { %v665_v57 = vadd.f32 %v1227_v56, %v664_v44 }
 0x1e7   :  { %v1460_v45 = vpop.f32.mrf.mxu0 }
 0x1e8   :  { %v816_v0 = vadd.f32 %v815_v40, %v665_v57 }
 0x1fd   :  { %v1008_v49 = vpop.f32.mrf.mxu1 }
 0x1ff   :  { %v1565_v50 = vpop.f32.mrf.mxu1 }
 0x206   :  { %v919_v51 = vpop.f32.mrf.mxu0 }
 0x207   :  { %v920_v63 = vadd.f32 %v919_v51, %v816_v0 }
 0x208   :  { %v1530_v55 = vpop.f32.mrf.mxu0 }
 0x209   :  { %v1009_v3 = vadd.f32 %v1008_v49, %v920_v63 }
 0x21f   :  { %v1214_v61 = vpop.f32.mrf.mxu1 }
 0x221   :  { %v1635_v62 = vpop.f32.mrf.mxu1 }
 0x227   :  { %v1127_v4 = vpop.f32.mrf.mxu0 }
 0x228   :  { %v1128_v5 = vadd.f32 %v1127_v4, %v1009_v3 }
 0x229   :  { %v1600_v9 = vpop.f32.mrf.mxu0 }
 0x22a   :  { %v1215_v10 = vadd.f32 %v1214_v61, %v1128_v5 }
 0x22c   :  { %1219 = vst.msk [vmem:[%s2188_s4] sm:$0xff] %vm1218_vm2, %v1215_v10 }
 0x22d   :  { %1224 = vsyncpa [#allocation3], 1 }
 0x22e   :  { %1225 = vsyncpa [#allocation5], 1 }

</bundles_post_ra>
